<compile_context>
chip_gen: v6e
topology: v6e:2x2x1
jax: 0.10.0
libtpu: 0.0.40
codegen_flags: <defaults>
</compile_context>

<pallas_src>
import jax
import jax.numpy as jnp
from jax.experimental import pallas as pl
from jax.experimental.pallas import tpu as pltpu

BN_EPS = 1e-5


def critic_kernel(obs_ref, act_ref, slab_ref, out_ref):
    B, n_obs = obs_ref.shape
    n_actions = act_ref.shape[1]
    H = slab_ref.shape[0]

    obs = obs_ref[...]            # (B, n_obs)  batch-major, no wrapper transpose
    act = act_ref[...]            # (B, n_actions)
    slab = slab_ref[...]          # (H, n_obs + H + n_actions + 8) packed params

    # Static slices of the packed slab (pure vreg slicing, no extra DMAs).
    w1  = slab[:, 0:n_obs]                                  # (H, n_obs)
    w2h = slab[:, n_obs:n_obs + H]                          # (H, H)   hidden wrt obs_ff
    w2a = slab[:, n_obs + H:n_obs + H + n_actions]          # (H, A)   hidden wrt action
    p = n_obs + H + n_actions
    b1    = slab[:, p + 0:p + 1]                            # (H, 1)
    gamma = slab[:, p + 1:p + 2]                            # (H, 1)
    beta  = slab[:, p + 2:p + 3]                            # (H, 1)
    b2    = slab[:, p + 3:p + 4]                            # (H, 1)
    w3    = slab[:, p + 4:p + 5]                            # (H, 1)  output weight column
    b3    = slab[0:1, p + 5:p + 6]                          # (1, 1)

    # Contract the feature axis of a batch-major operand against the weight's
    # in-feature axis: (H, F) x (B, F) -> (H, B).  Keeps batch on lanes.
    dn_feat = (((1,), (1,)), ((), ()))

    # ---- input_layer ---------------------------------------------------------
    lin = jax.lax.dot_general(w1, obs, dn_feat,
                              preferred_element_type=jnp.float32) + b1   # (H, B)

    # ---- BatchNorm1d, training mode (batch mean, biased batch variance) ------
    mean = jnp.mean(lin, axis=1, keepdims=True)             # (H, 1) lane reduce
    diff = lin - mean
    var = jnp.mean(diff * diff, axis=1, keepdims=True)      # (H, 1)
    scale = gamma * jax.lax.rsqrt(var + BN_EPS)              # gamma fused into scale
    h = jnp.maximum(diff * scale + beta, 0.0)                # BN + ReLU, (H, B)

    # ---- hidden_layer over cat([obs_ff, action]): two accumulating dots ------
    # (no concatenate -> no (H+A, B) VMEM copy; action stays batch-major)
    x = (jnp.dot(w2h, h, preferred_element_type=jnp.float32)
         + jax.lax.dot_general(w2a, act, dn_feat, preferred_element_type=jnp.float32)
         + b2)
    x = jnp.maximum(x, 0.0)                                  # (H, B)

    # ---- output_layer: VPU multiply + sublane reduce (no third MXU pass) ------
    q = jnp.sum(x * w3, axis=0, keepdims=True) + b3          # (1, B) lane-dense
    out_ref[...] = q.astype(out_ref.dtype)


def critic_forward(obs, action, slab):
    """obs: (B, n_obs), action: (B, n_actions), slab: packed params -> q: (B, 1)."""
    B, n_obs = obs.shape
    n_actions = action.shape[1]
    n_hidden = slab.shape[0]

    flops = 2 * B * (n_hidden * n_obs + n_hidden * (n_hidden + n_actions) + n_hidden)
    bytes_accessed = 4 * (obs.size + action.size + slab.size + B)

    q_t = pl.pallas_call(
        critic_kernel,
        out_shape=jax.ShapeDtypeStruct((1, B), jnp.float32),
        in_specs=[pl.BlockSpec(memory_space=pltpu.MemorySpace.VMEM)] * 3,
        out_specs=pl.BlockSpec(memory_space=pltpu.MemorySpace.VMEM),
        cost_estimate=pl.CostEstimate(
            flops=flops, transcendentals=n_hidden, bytes_accessed=bytes_accessed),
    )(obs, action, slab)
    # (1, B) -> (B, 1): same flat element order, so this reshape is free.
    return q_t.reshape(B, 1)


def init_params(key, n_obs, n_hidden, n_actions):
    """PyTorch-style (uniform +-1/sqrt(fan_in)) init, packed into one slab.

    Slab layout (n_hidden rows):
      cols [0, n_obs)                          : input_layer weight  W1
      cols [n_obs, n_obs+H)                    : hidden_layer weight wrt obs_ff
      cols [n_obs+H, n_obs+H+A)                : hidden_layer weight wrt action
      col  p+0 : b1, p+1 : gamma, p+2 : beta, p+3 : b2, p+4 : w3 column,
      [0, p+5] : b3; remaining entries zero.    (p = n_obs + H + A)
    """
    ks = jax.random.split(key, 6)

    def lin(kw, kb, fan_in, fan_out):
        bound = 1.0 / jnp.sqrt(jnp.float32(fan_in))
        w = jax.random.uniform(kw, (fan_out, fan_in), jnp.float32, -bound, bound)
        b = jax.random.uniform(kb, (fan_out,), jnp.float32, -bound, bound)
        return w, b

    w1, b1 = lin(ks[0], ks[1], n_obs, n_hidden)
    w2, b2 = lin(ks[2], ks[3], n_hidden + n_actions, n_hidden)
    w3, b3 = lin(ks[4], ks[5], n_hidden, 1)            # w3: (1, n_hidden), b3: (1,)

    gamma = jnp.ones((n_hidden,), jnp.float32)         # BatchNorm1d weight
    beta = jnp.zeros((n_hidden,), jnp.float32)         # BatchNorm1d bias

    p = n_obs + n_hidden + n_actions
    slab = jnp.zeros((n_hidden, p + 8), jnp.float32)
    slab = slab.at[:, 0:n_obs].set(w1)
    slab = slab.at[:, n_obs:n_obs + n_hidden].set(w2[:, :n_hidden])
    slab = slab.at[:, n_obs + n_hidden:p].set(w2[:, n_hidden:])
    slab = slab.at[:, p + 0].set(b1)
    slab = slab.at[:, p + 1].set(gamma)
    slab = slab.at[:, p + 2].set(beta)
    slab = slab.at[:, p + 3].set(b2)
    slab = slab.at[:, p + 4].set(w3[0])
    slab = slab.at[0, p + 5].set(b3[0])
    return slab


def critic_reference(obs, action, slab):
    """Pure-JAX reference (standard batch-major orientation)."""
    B, n_obs = obs.shape
    n_actions = action.shape[1]
    H = slab.shape[0]
    p = n_obs + H + n_actions

    w1 = slab[:, 0:n_obs]
    w2 = slab[:, n_obs:p]                               # (H, H + A)
    b1, gamma, beta, b2 = slab[:, p + 0], slab[:, p + 1], slab[:, p + 2], slab[:, p + 3]
    w3_col, b3 = slab[:, p + 4], slab[0, p + 5]

    h = obs @ w1.T + b1
    mean = jnp.mean(h, axis=0)
    var = jnp.mean((h - mean) ** 2, axis=0)
    h = (h - mean) * jax.lax.rsqrt(var + BN_EPS) * gamma + beta
    h = jnp.maximum(h, 0.0)
    x = jnp.maximum(jnp.concatenate([h, action], axis=1) @ w2.T + b2, 0.0)
    return x @ w3_col[:, None] + b3


if __name__ == "__main__":
    B, n_obs, n_hidden, n_actions = 8, 16, 32, 8

    key = jax.random.PRNGKey(0)
    k_obs, k_act, k_params = jax.random.split(key, 3)

    obs = jax.random.normal(k_obs, (B, n_obs), jnp.float32)
    action = jax.random.normal(k_act, (B, n_actions), jnp.float32)
    slab = init_params(k_params, n_obs, n_hidden, n_actions)

    q = jax.block_until_ready(critic_forward(obs, action, slab))
    q_ref = critic_reference(obs, action, slab)

    assert q.shape == (B, 1)
    assert jnp.allclose(q, q_ref, atol=1e-4, rtol=1e-4), (q, q_ref)

    print("KERNEL_OK")
</pallas_src>

<mosaic_0001>
module attributes {stable_mosaic.version = 11 : i64} {
  func.func @critic_kernel(%arg0: memref<8x16xf32, #tpu.memory_space<vmem>>, %arg1: memref<8x8xf32, #tpu.memory_space<vmem>>, %arg2: memref<32x64xf32, #tpu.memory_space<vmem>>, %arg3: memref<1x8xf32, #tpu.memory_space<vmem>>) attributes {dimension_semantics = [], scalar_prefetch = 0 : i64, scratch_operands = 0 : i64, tpu.core_type = #tpu.core_type<tc>} {
    %c0 = arith.constant 0 : index
    %c0_0 = arith.constant 0 : index
    %0 = vector.load %arg0[%c0, %c0_0] : memref<8x16xf32, #tpu.memory_space<vmem>>, vector<8x16xf32>
    %c0_1 = arith.constant 0 : index
    %c0_2 = arith.constant 0 : index
    %1 = vector.load %arg1[%c0_1, %c0_2] : memref<8x8xf32, #tpu.memory_space<vmem>>, vector<8x8xf32>
    %c0_3 = arith.constant 0 : index
    %c0_4 = arith.constant 0 : index
    %2 = vector.load %arg2[%c0_3, %c0_4] : memref<32x64xf32, #tpu.memory_space<vmem>>, vector<32x64xf32>
    %3 = vector.extract_strided_slice %2 {offsets = [0, 0], sizes = [32, 16], strides = [1, 1]} : vector<32x64xf32> to vector<32x16xf32>
    %4 = vector.extract_strided_slice %2 {offsets = [0, 16], sizes = [32, 32], strides = [1, 1]} : vector<32x64xf32> to vector<32x32xf32>
    %5 = vector.extract_strided_slice %2 {offsets = [0, 48], sizes = [32, 8], strides = [1, 1]} : vector<32x64xf32> to vector<32x8xf32>
    %6 = vector.extract_strided_slice %2 {offsets = [0, 56], sizes = [32, 1], strides = [1, 1]} : vector<32x64xf32> to vector<32x1xf32>
    %7 = vector.extract_strided_slice %2 {offsets = [0, 57], sizes = [32, 1], strides = [1, 1]} : vector<32x64xf32> to vector<32x1xf32>
    %8 = vector.extract_strided_slice %2 {offsets = [0, 58], sizes = [32, 1], strides = [1, 1]} : vector<32x64xf32> to vector<32x1xf32>
    %9 = vector.extract_strided_slice %2 {offsets = [0, 59], sizes = [32, 1], strides = [1, 1]} : vector<32x64xf32> to vector<32x1xf32>
    %10 = vector.extract_strided_slice %2 {offsets = [0, 60], sizes = [32, 1], strides = [1, 1]} : vector<32x64xf32> to vector<32x1xf32>
    %11 = vector.extract_strided_slice %2 {offsets = [0, 61], sizes = [1, 1], strides = [1, 1]} : vector<32x64xf32> to vector<1x1xf32>
    %cst = arith.constant dense<0.000000e+00> : vector<32x8xf32>
    %12 = tpu.matmul %3, %0, %cst {dimension_numbers = #tpu.dot_dimension_numbers<[1], [1], [0], [0], [0, 0, 1, 0], [], []>} : vector<32x16xf32>, vector<8x16xf32>, vector<32x8xf32> -> vector<32x8xf32>
    %13 = vector.broadcast %6 : vector<32x1xf32> to vector<32x8xf32>
    %14 = arith.addf %12, %13 : vector<32x8xf32>
    %cst_5 = arith.constant dense<0.000000e+00> : vector<32xf32>
    %15 = vector.multi_reduction <add>, %14, %cst_5 [1] : vector<32x8xf32> to vector<32xf32>
    %16 = vector.shape_cast %15 : vector<32xf32> to vector<32x1xf32>
    %cst_6 = arith.constant 8.000000e+00 : f32
    %17 = vector.broadcast %cst_6 : f32 to vector<32x1xf32>
    %18 = arith.divf %16, %17 : vector<32x1xf32>
    %19 = vector.broadcast %18 : vector<32x1xf32> to vector<32x8xf32>
    %20 = arith.subf %14, %19 : vector<32x8xf32>
    %21 = arith.mulf %20, %20 : vector<32x8xf32>
    %cst_7 = arith.constant dense<0.000000e+00> : vector<32xf32>
    %22 = vector.multi_reduction <add>, %21, %cst_7 [1] : vector<32x8xf32> to vector<32xf32>
    %23 = vector.shape_cast %22 : vector<32xf32> to vector<32x1xf32>
    %cst_8 = arith.constant 8.000000e+00 : f32
    %24 = vector.broadcast %cst_8 : f32 to vector<32x1xf32>
    %25 = arith.divf %23, %24 : vector<32x1xf32>
    %cst_9 = arith.constant 9.99999974E-6 : f32
    %26 = vector.broadcast %cst_9 : f32 to vector<32x1xf32>
    %27 = arith.addf %25, %26 : vector<32x1xf32>
    %28 = math.rsqrt %27 : vector<32x1xf32>
    %29 = arith.mulf %7, %28 : vector<32x1xf32>
    %30 = vector.broadcast %29 : vector<32x1xf32> to vector<32x8xf32>
    %31 = arith.mulf %20, %30 : vector<32x8xf32>
    %32 = vector.broadcast %8 : vector<32x1xf32> to vector<32x8xf32>
    %33 = arith.addf %31, %32 : vector<32x8xf32>
    %cst_10 = arith.constant 0.000000e+00 : f32
    %34 = vector.broadcast %cst_10 : f32 to vector<32x8xf32>
    %35 = arith.maximumf %33, %34 : vector<32x8xf32>
    %cst_11 = arith.constant dense<0.000000e+00> : vector<32x8xf32>
    %36 = tpu.matmul %4, %35, %cst_11 {dimension_numbers = #tpu.dot_dimension_numbers<[1], [0], [0], [1], [0, 0, 1, 1], [], []>} : vector<32x32xf32>, vector<32x8xf32>, vector<32x8xf32> -> vector<32x8xf32>
    %cst_12 = arith.constant dense<0.000000e+00> : vector<32x8xf32>
    %37 = tpu.matmul %5, %1, %cst_12 {dimension_numbers = #tpu.dot_dimension_numbers<[1], [1], [0], [0], [0, 0, 1, 0], [], []>} : vector<32x8xf32>, vector<8x8xf32>, vector<32x8xf32> -> vector<32x8xf32>
    %38 = arith.addf %36, %37 : vector<32x8xf32>
    %39 = vector.broadcast %9 : vector<32x1xf32> to vector<32x8xf32>
    %40 = arith.addf %38, %39 : vector<32x8xf32>
    %cst_13 = arith.constant 0.000000e+00 : f32
    %41 = vector.broadcast %cst_13 : f32 to vector<32x8xf32>
    %42 = arith.maximumf %40, %41 : vector<32x8xf32>
    %43 = vector.broadcast %10 : vector<32x1xf32> to vector<32x8xf32>
    %44 = arith.mulf %42, %43 : vector<32x8xf32>
    %cst_14 = arith.constant dense<0.000000e+00> : vector<8xf32>
    %45 = vector.multi_reduction <add>, %44, %cst_14 [0] : vector<32x8xf32> to vector<8xf32>
    %46 = vector.shape_cast %45 : vector<8xf32> to vector<1x8xf32>
    %47 = vector.broadcast %11 : vector<1x1xf32> to vector<1x8xf32>
    %48 = arith.addf %46, %47 : vector<1x8xf32>
    %c0_15 = arith.constant 0 : index
    %c0_16 = arith.constant 0 : index
    %49 = vector.load %arg3[%c0_15, %c0_16] : memref<1x8xf32, #tpu.memory_space<vmem>>, vector<1x8xf32>
    tpu.vector_store %arg3[%c0_15, %c0_16], %48 {strides = array<i32>} : memref<1x8xf32, #tpu.memory_space<vmem>>, vector<1x8xf32>,
    return
  }
}

</mosaic_0001>

<bundles_post_ra>
// kernel: tpu_custom_call.1
= control target key start
LH: loop header
LB: loop body
LE: loop exit
PB: predicated region body
PF: predicated region fallthrough
CT: control target
= control target key end

     0   :  { %8 = vsyncpa [#allocation3], 0  ;;  %s884_s0 = inlined_call_operand.hbm [shape: f32[8,16], index: 0, kind: input, shape index: {}]   ;;  %s885_s1 = inlined_call_operand.hbm [shape: f32[8,8], index: 1, kind: input, shape index: {}]   ;;  %s886_s2 = inlined_call_operand.hbm [shape: f32[32,64], index: 2, kind: input, shape index: {}]   ;;  %s887_s3 = inlined_call_operand.hbm [shape: f32[1,8], index: 3, kind: output, shape index: {}]  }
   0x1   :  { %9 = vsyncpa [#allocation6], 0 }
   0x2   :  { %10 = vsyncpa [#allocation4], 0  ;;  %s755_s12 = smov [#allocation5]   ;;  %s756_s14 = smov [#allocation2]  }
   0x3   :  { %s27_s13 = sshll.u32 %s755_s12, 4  ;;  %s17_s15 = sshll.u32 %s756_s14, 4  ;;  %s28_s13 = int_to_ptr.vmem [resolvable:$true] %s27_s13  ;;  %s18_s15 = int_to_ptr.vmem [resolvable:$true] %s17_s15 }
   0x4   :  { %s677_s16 = scalar_lea.vmem %s28_s13, 128  ;;  %p682_p1 = scmp.lt.s32.totalorder %s28_s13, %s28_s13 }
   0x5   :  { %p678_p0 = scmp.ne.s32.totalorder %s28_s13, %s677_s16  ;;  %p683_p2 = scmp.lt.s32.totalorder %s677_s16, %s677_s16 }
   0x7   :  { %p684_p3 = por %p683_p2, %p682_p1 }
   0x9   :  { %p685_p4 = pnand %p684_p3, %p678_p0 }
   0xb   :  { %688 = shalt.err (!%p685_p4)
}
   0xc   :  { %30 = dma.hbm_to_vmem [thread:$0]  %s885_s1, 128, %s28_s13, [#allocation6]  }
   0xd   :  { %s697_s19 = scalar_lea.vmem %s18_s15, 128  ;;  %p702_p6 = scmp.lt.s32.totalorder %s18_s15, %s18_s15 }
   0xe   :  { %p698_p5 = scmp.ne.s32.totalorder %s18_s15, %s697_s19  ;;  %p703_p7 = scmp.lt.s32.totalorder %s697_s19, %s697_s19 }
  0x10   :  { %p704_p8 = por %p703_p7, %p702_p6 }
  0x12   :  { %p705_p9 = pnand %p704_p8, %p698_p5 }
  0x14   :  { %708 = shalt.err (!%p705_p9)
}
  0x15   :  { %20 = dma.hbm_to_vmem [thread:$0]  %s884_s0, 128, %s18_s15, [#allocation3]  }
  0x16   :  { %s757_s22 = smov [#allocation7]  }
  0x17   :  { %s36_s23 = sshll.u32 %s757_s22, 4  ;;  %s37_s23 = int_to_ptr.vmem [resolvable:$true] %s36_s23 }
  0x18   :  { %s717_s24 = scalar_lea.vmem %s37_s23, 512  ;;  %p722_p11 = scmp.lt.s32.totalorder %s37_s23, %s37_s23 }
  0x19   :  { %p718_p10 = scmp.ne.s32.totalorder %s37_s23, %s717_s24  ;;  %p723_p12 = scmp.lt.s32.totalorder %s717_s24, %s717_s24 }
  0x1b   :  { %p724_p13 = por %p723_p12, %p722_p11 }
  0x1d   :  { %p725_p0 = pnand %p724_p13, %p718_p10 }
  0x1f   :  { %728 = shalt.err (!%p725_p0)
}
  0x20   :  { %s758_s1 = smov 128   ;;  %s759_s25 = smov 8  }
  0x21   :  { %42 = dma.hbm_to_vmem [thread:$0]  %s886_s2, 512, %s37_s23, [#allocation6], %s758_s1, %s758_s1, %s759_s25  }
  0x22   :  { %749 = dma.done.wait [#allocation3], 128  }
  0x23   :  { %750 = vsyncadd [#allocation3], 4294967168 }
  0x24   :  { %751 = dma.done.wait [#allocation6], 640  }
  0x25   :  { %752 = vsyncadd [#allocation6], 4294966656  ;;  %v760_v0 = vmov 56   ;;  %vm78_vm0 = vcmask 130048   ;;  %v52_v1 = vld [vmem:[#allocation2] sm:$0xff]  ;;  %v798_v2 = vld [vmem:[#allocation7] sm:$0xff] }
  0x26   :  { %648 = vset.pattern.permute.xlu1 %v760_v0  ;;  %647 = vset.pattern.permute.xlu0 %v760_v0  ;;  %v801_v3 = vld [vmem:[#allocation7 + $0x8] sm:$0xff]  ;;  %v803_v4 = vld [vmem:[#allocation7 + $0x18] sm:$0xff]  ;;  %v806_v5 = vld [vmem:[#allocation7 + $0x10] sm:$0xff]  ;;  %vm175_vm1 = vcmask 64512   ;;  %v761_v42 = vmov 57   ;;  %v762_v60 = vmov 58  }
  0x27   :  { %595 = vmatprep.subr.msk.mxu0 %vm78_vm0, %v52_v1  ;;  %597 = vmatprep.mubr.msk.f32.mxu0 %vm78_vm0, %v798_v2  ;;  %v53_v59 = vld [vmem:[#allocation5] sm:$0xff]  ;;  %s763_s0 = smov 80   ;;  %s764_s2 = smov 112   ;;  %vm389_vm2 = vcmask 261120   ;;  %vm545_vm3 = vcmask 57344  }
  0x28   :  { %596 = vmatpush3.xpose.msk.msra.mxu0 %vm78_vm0, %v52_v1  ;;  %65 = vperm.xlu1 %648, %v801_v3   ;;  %v765_v1 = vmov 59   ;;  %s768_s28 = smov [#allocation8]  }
  0x29   :  { %75 = vperm.xlu0 %647, %v803_v4   ;;  %603 = vmatprep.subr.msk.mxu1 %vm175_vm1, %v53_v59  ;;  %s553_s29 = sshll.u32 %s768_s28, 4  ;;  %s554_s29 = int_to_ptr.vmem [resolvable:$true] %s553_s29 }
  0x2a   :  { %604 = vmatpush3.xpose.msk.msra.mxu1 %vm175_vm1, %v53_v59  ;;  %s729_s30 = scalar_lea.vmem %s554_s29, 16  ;;  %s733_s4 = scalar_lea.vmem %s554_s29, 32 }
  0x2b   :  { %598 = vmatmul.mubr.msk.f32.vlgmr.msra.gmra.mxu0 %vm78_vm0, %v801_v3  ;;  %p730_p1 = scmp.ne.s32.totalorder %s554_s29, %s729_s30  ;;  %p734_p2 = scmp.lt.s32.totalorder %s554_s29, %s554_s29 }
  0x2c   :  { %600 = vmatprep.mubr.msk.f32.mxu0 %vm78_vm0, %v806_v5  ;;  %60 = vperm.xlu1 %648, %v798_v2   ;;  %p735_p3 = scmp.lt.s32.totalorder %s733_s4, %s729_s30 }
  0x2d   :  { %70 = vperm.xlu0 %647, %v806_v5  }
  0x2e   :  { %p736_p4 = por %p735_p3, %p734_p2 }
  0x2f   :  { %601 = vmatmul.mubr.msk.f32.gmra.mxu0 %vm78_vm0, %v803_v4 }
  0x30   :  { %649 = vset.pattern.permute.xlu1 %v761_v42  ;;  %p737_p5 = pnand %p736_p4, %p730_p1 }
  0x31   :  { %650 = vset.pattern.permute.xlu0 %v761_v42 }
  0xa3   :  { %v66_v8 = vpop.permute.xlu1 %65 }
  0xa4   :  { %v76_v6 = vpop.permute.xlu0 %75 }
  0xa7   :  { %v61_v17 = vpop.permute.xlu1 %60 }
  0xa8   :  { %v71_v12 = vpop.permute.xlu0 %70 }
  0xeb   :  { %v599_v7 = vpop.f32.mrf.mxu0 }
  0xec   :  { %v162_v14 = vadd.f32 %v599_v7, %v66_v8  ;;  %v767_v7 = vmov 61  }
  0xed   :  { %v156_v9 = vpop.f32.mrf.mxu0 }
  0xee   :  { %v157_v19 = vadd.f32 %v156_v9, %v61_v17  ;;  %v179_v20 = vsel %vm175_vm1, %v162_v14, 0.0 }
  0xef   :  { %v602_v10 = vpop.f32.mrf.mxu0 }
  0xf0   :  { %v172_v11 = vadd.f32 %v602_v10, %v76_v6  ;;  %v176_v21 = vsel %vm175_vm1, %v157_v19, 0.0  ;;  %v766_v6 = vmov 60  }
  0xf1   :  { %v166_v13 = vpop.f32.mrf.mxu0 }
  0xf2   :  { %v167_v15 = vadd.f32 %v166_v13, %v71_v12  ;;  %v185_v16 = vsel %vm175_vm1, %v172_v11, 0.0 }
  0xf3   :  { %186 = vadd.xlane.f32.xlu0 %v185_v16 }
  0xf4   :  { %v182_v18 = vsel %vm175_vm1, %v167_v15, 0.0 }
  0xf5   :  { %183 = vadd.xlane.f32.xlu1 %v182_v18 }
  0xf7   :  { %180 = vadd.xlane.f32.xlu0 %v179_v20 }
  0xfb   :  { %177 = vadd.xlane.f32.xlu0 %v176_v21 }
 0x17c   :  { %v187_v22 = vpop.xlane.xlu0 %186 }
 0x17d   :  { %v192_v23 = vmul.f32 0.125, %v187_v22 }
 0x17e   :  { %v184_v24 = vpop.xlane.xlu1 %183 }
 0x17f   :  { %v818_v25 = vsub.f32 %v172_v11, %v192_v23  ;;  %v191_v26 = vmul.f32 0.125, %v184_v24 }
 0x180   :  { %v181_v27 = vpop.xlane.xlu0 %180 }
 0x181   :  { %v820_v28 = vsub.f32 %v167_v15, %v191_v26  ;;  %v190_v29 = vmul.f32 0.125, %v181_v27  ;;  %v200_v30 = vmul.f32 %v818_v25, %v818_v25 }
 0x183   :  { %v824_v31 = vsub.f32 %v162_v14, %v190_v29  ;;  %v210_v32 = vsel %vm175_vm1, %v200_v30, 0.0  ;;  %v199_v33 = vmul.f32 %v820_v28, %v820_v28 }
 0x184   :  { %211 = vadd.xlane.f32.xlu1 %v210_v32  ;;  %v178_v34 = vpop.xlane.xlu0 %177 }
 0x185   :  { %v189_v35 = vmul.f32 0.125, %v178_v34  ;;  %v207_v36 = vsel %vm175_vm1, %v199_v33, 0.0  ;;  %v198_v37 = vmul.f32 %v824_v31, %v824_v31 }
 0x186   :  { %208 = vadd.xlane.f32.xlu0 %v207_v36 }
 0x187   :  { %v832_v38 = vsub.f32 %v157_v19, %v189_v35  ;;  %v204_v39 = vsel %vm175_vm1, %v198_v37, 0.0 }
 0x188   :  { %205 = vadd.xlane.f32.xlu1 %v204_v39 }
 0x189   :  { %v197_v40 = vmul.f32 %v832_v38, %v832_v38 }
 0x18b   :  { %v201_v41 = vsel %vm175_vm1, %v197_v40, 0.0 }
 0x18c   :  { %202 = vadd.xlane.f32.xlu0 %v201_v41 }
 0x20d   :  { %v212_v43 = vpop.xlane.xlu1 %211 }
 0x20e   :  { %v216_v44 = vmul.f32 0.125, %v212_v43 }
 0x20f   :  { %v209_v45 = vpop.xlane.xlu0 %208 }
 0x210   :  { %v220_v46 = vadd.f32 1e-05, %v216_v44  ;;  %v215_v47 = vmul.f32 0.125, %v209_v45 }
 0x211   :  { %v206_v48 = vpop.xlane.xlu1 %205 }
 0x212   :  { %661 = vrsqrt.f32 %v220_v46  ;;  %v219_v49 = vadd.f32 1e-05, %v215_v47  ;;  %v214_v50 = vmul.f32 0.125, %v206_v48 }
 0x214   :  { %663 = vrsqrt.f32 %v219_v49  ;;  %v218_v51 = vadd.f32 1e-05, %v214_v50 }
 0x215   :  { %v203_v52 = vpop.xlane.xlu0 %202 }
 0x216   :  { %665 = vrsqrt.f32 %v218_v51  ;;  %v213_v53 = vmul.f32 0.125, %v203_v52 }
 0x218   :  { %v217_v55 = vadd.f32 1e-05, %v213_v53 }
 0x21a   :  { %667 = vrsqrt.f32 %v217_v55 }
 0x21f   :  { %v662_v54 = vpop.eup %661 }
 0x220   :  { %v228_v56 = vmul.f32 %v662_v54, %v803_v4 }
 0x221   :  { %v664_v57 = vpop.eup %663 }
 0x222   :  { %246 = vperm.xlu1 %649, %v228_v56   ;;  %v227_v58 = vmul.f32 %v664_v57, %v806_v5 }
 0x223   :  { %v666_v61 = vpop.eup %665 }
 0x224   :  { %241 = vperm.xlu0 %650, %v227_v58   ;;  %v226_v62 = vmul.f32 %v666_v61, %v801_v3 }
 0x226   :  { %651 = vset.pattern.permute.xlu1 %v762_v60 }
 0x227   :  { %266 = vperm.xlu1 %651, %v803_v4   ;;  %v668_v63 = vpop.eup %667 }
 0x228   :  { %281 = vrot.lane.b32.xlu0 %v806_v5, %s763_s0  ;;  %v225_v0 = vmul.f32 %v668_v63, %v798_v2 }
 0x229   :  { %656 = vset.pattern.permute.xlu0 %v765_v1 }
 0x22b   :  { %652 = vset.pattern.permute.xlu1 %v761_v42 }
 0x22c   :  { %236 = vperm.xlu1 %652, %v226_v62   ;;  %381 = vrot.lane.b32.xlu0 %v798_v2, %s764_s2 }
 0x230   :  { %653 = vset.pattern.permute.xlu1 %v762_v60  ;;  %385 = vrot.lane.b32.xlu0 %v806_v5, %s764_s2 }
 0x231   :  { %262 = vperm.xlu1 %653, %v806_v5  }
 0x234   :  { %484 = vperm.xlu0 %656, %v798_v2  }
 0x235   :  { %654 = vset.pattern.permute.xlu1 %v761_v42 }
 0x236   :  { %231 = vperm.xlu1 %654, %v225_v0  }
 0x238   :  { %496 = vperm.xlu0 %656, %v803_v4  }
 0x23a   :  { %655 = vset.pattern.permute.xlu1 %v762_v60 }
 0x23b   :  { %258 = vperm.xlu1 %655, %v801_v3  }
 0x23c   :  { %659 = vset.pattern.permute.xlu0 %v766_v6 }
 0x23d   :  { %512 = vperm.xlu0 %659, %v801_v3  }
 0x23f   :  { %254 = vperm.xlu1 %655, %v798_v2  }
 0x241   :  { %660 = vset.pattern.permute.xlu0 %v767_v7 }
 0x242   :  { %541 = vperm.xlu0 %660, %v798_v2  }
 0x243   :  { %277 = vrot.lane.b32.xlu1 %v798_v2, %s763_s0 }
 0x244   :  { %657 = vset.pattern.permute.xlu1 %v765_v1 }
 0x247   :  { %279 = vrot.lane.b32.xlu1 %v801_v3, %s763_s0 }
 0x24b   :  { %283 = vrot.lane.b32.xlu1 %v803_v4, %s763_s0 }
 0x24f   :  { %383 = vrot.lane.b32.xlu1 %v801_v3, %s764_s2 }
 0x253   :  { %387 = vrot.lane.b32.xlu1 %v803_v4, %s764_s2 }
 0x257   :  { %488 = vperm.xlu1 %657, %v801_v3  }
 0x25b   :  { %492 = vperm.xlu1 %657, %v806_v5  }
 0x25f   :  { %658 = vset.pattern.permute.xlu1 %v766_v6 }
 0x260   :  { %508 = vperm.xlu1 %658, %v798_v2  }
 0x264   :  { %516 = vperm.xlu1 %658, %v806_v5  }
 0x268   :  { %520 = vperm.xlu1 %658, %v803_v4  }
 0x29d   :  { %v247_v8 = vpop.permute.xlu1 %246 }
 0x29e   :  { %v252_v10 = vmul.f32 %v247_v8, %v818_v25 }
 0x29f   :  { %v242_v9 = vpop.permute.xlu0 %241 }
 0x2a0   :  { %v251_v2 = vmul.f32 %v242_v9, %v820_v28 }
 0x2a2   :  { %v267_v11 = vpop.permute.xlu1 %266 }
 0x2a3   :  { %v272_v12 = vadd.f32 %v267_v11, %v252_v10  ;;  %v282_v3 = vpop.permute.xlu0 %281 }
 0x2a5   :  { %v276_v13 = vmax.f32 %v272_v12, 0.0 }
 0x2a7   :  { %611 = vmatprep.subr.mxu0 %v276_v13  ;;  %625 = vmatprep.subr.mxu1 %v276_v13  ;;  %v237_v14 = vpop.permute.xlu1 %236  ;;  %v382_v15 = vpop.permute.xlu0 %381 }
 0x2a8   :  { %612 = vmatpush3.msra.mxu0 %v276_v13  ;;  %619 = vmatprep.mubr.msk.f32.mxu0 %vm389_vm2, %v382_v15  ;;  %v250_v18 = vmul.f32 %v237_v14, %v824_v31 }
 0x2ab   :  { %v386_v28 = vpop.permute.xlu0 %385 }
 0x2ac   :  { %v263_v5 = vpop.permute.xlu1 %262 }
 0x2ad   :  { %v271_v4 = vadd.f32 %v263_v5, %v251_v2 }
 0x2af   :  { %v275_v16 = vmax.f32 %v271_v4, 0.0  ;;  %v485_v36 = vpop.permute.xlu0 %484 }
 0x2b1   :  { %v232_v17 = vpop.permute.xlu1 %231  ;;  %613 = vmatprep.subr.mxu0 %v275_v16 }
 0x2b2   :  { %614 = vmatpush3.msra.mxu0 %v275_v16  ;;  %v249_v21 = vmul.f32 %v232_v17, %v832_v38 }
 0x2b3   :  { %v497_v40 = vpop.permute.xlu0 %496 }
 0x2b6   :  { %v259_v19 = vpop.permute.xlu1 %258 }
 0x2b7   :  { %v270_v20 = vadd.f32 %v259_v19, %v250_v18 }
 0x2b8   :  { %v513_v52 = vpop.permute.xlu0 %512 }
 0x2b9   :  { %v274_v22 = vmax.f32 %v270_v20, 0.0 }
 0x2ba   :  { %v255_v23 = vpop.permute.xlu1 %254 }
 0x2bb   :  { %v269_v24 = vadd.f32 %v255_v23, %v249_v21  ;;  %615 = vmatprep.subr.mxu0 %v274_v22 }
 0x2bc   :  { %616 = vmatpush3.msra.mxu0 %v274_v22 }
 0x2bd   :  { %v273_v25 = vmax.f32 %v269_v24, 0.0  ;;  %v542_v15 = vpop.permute.xlu0 %541 }
 0x2be   :  { %v278_v26 = vpop.permute.xlu1 %277 }
 0x2bf   :  { %605 = vmatprep.mubr.msk.f32.mxu1 %vm175_vm1, %v278_v26  ;;  %617 = vmatprep.subr.mxu0 %v273_v25 }
 0x2c0   :  { %618 = vmatpush3.msra.mxu0 %v273_v25 }
 0x2c2   :  { %v280_v27 = vpop.permute.xlu1 %279 }
 0x2c3   :  { %606 = vmatmul.mubr.msk.f32.vlgmr.msra.gmra.mxu1 %vm175_vm1, %v280_v27 }
 0x2c4   :  { %629 = vmatpush3.msra.mxu1 %v276_v13  ;;  %608 = vmatprep.mubr.msk.f32.mxu1 %vm175_vm1, %v282_v3 }
 0x2c5   :  { %626 = vmatprep.subr.mxu1 %v275_v16 }
 0x2c6   :  { %630 = vmatpush3.msra.mxu1 %v275_v16  ;;  %v284_v29 = vpop.permute.xlu1 %283 }
 0x2c7   :  { %627 = vmatprep.subr.mxu1 %v274_v22  ;;  %609 = vmatmul.mubr.msk.f32.gmra.mxu1 %vm175_vm1, %v284_v29 }
 0x2c8   :  { %631 = vmatpush3.msra.mxu1 %v274_v22  ;;  %622 = vmatprep.mubr.msk.f32.mxu1 %vm389_vm2, %v386_v28 }
 0x2c9   :  { %628 = vmatprep.subr.mxu1 %v273_v25 }
 0x2ca   :  { %632 = vmatpush3.msra.mxu1 %v273_v25  ;;  %v384_v30 = vpop.permute.xlu1 %383 }
 0x2cb   :  { %620 = vmatmul.mubr.msk.f32.vlgmr.msra.gmra.mxu0 %vm389_vm2, %v384_v30 }
 0x2ce   :  { %v388_v31 = vpop.permute.xlu1 %387 }
 0x2cf   :  { %623 = vmatmul.mubr.msk.f32.vlgmr.msra.gmra.mxu1 %vm389_vm2, %v388_v31 }
 0x2d2   :  { %v489_v32 = vpop.permute.xlu1 %488 }
 0x2d6   :  { %v493_v34 = vpop.permute.xlu1 %492 }
 0x2db   :  { %v509_v38 = vpop.permute.xlu1 %508 }
 0x2df   :  { %v517_v47 = vpop.permute.xlu1 %516 }
 0x2e3   :  { %v521_v62 = vpop.permute.xlu1 %520 }
 0x383   :  { %v607_v33 = vpop.f32.mrf.mxu1 }
 0x385   :  { %v362_v35 = vpop.f32.mrf.mxu1 }
 0x387   :  { %v610_v37 = vpop.f32.mrf.mxu1 }
 0x389   :  { %v372_v42 = vpop.f32.mrf.mxu1 }
 0x38b   :  { %v621_v39 = vpop.f32.mrf.mxu0 }
 0x38c   :  { %v470_v41 = vadd.f32 %v621_v39, %v607_v33 }
 0x38d   :  { %v464_v43 = vpop.f32.mrf.mxu0 }
 0x38e   :  { %v500_v44 = vadd.f32 %v489_v32, %v470_v41  ;;  %v465_v45 = vadd.f32 %v464_v43, %v362_v35 }
 0x38f   :  { %v624_v46 = vpop.f32.mrf.mxu1 }
 0x390   :  { %v499_v48 = vadd.f32 %v485_v36, %v465_v45  ;;  %v480_v49 = vadd.f32 %v624_v46, %v610_v37  ;;  %v504_v50 = vmax.f32 %v500_v44, 0.0 }
 0x391   :  { %v474_v51 = vpop.f32.mrf.mxu1 }
 0x392   :  { %v503_v53 = vmax.f32 %v499_v48, 0.0  ;;  %v502_v54 = vadd.f32 %v497_v40, %v480_v49  ;;  %v475_v55 = vadd.f32 %v474_v51, %v372_v42  ;;  %v524_v59 = vmul.f32 %v513_v52, %v504_v50 }
 0x394   :  { %v523_v56 = vmul.f32 %v509_v38, %v503_v53  ;;  %v506_v57 = vmax.f32 %v502_v54, 0.0  ;;  %v501_v58 = vadd.f32 %v493_v34, %v475_v55  ;;  %v528_v1 = vsel %vm175_vm1, %v524_v59, 0.0 }
 0x396   :  { %v505_v60 = vmax.f32 %v501_v58, 0.0  ;;  %v527_v61 = vsel %vm175_vm1, %v523_v56, 0.0  ;;  %v526_v63 = vmul.f32 %v521_v62, %v506_v57 }
 0x397   :  { %v529_v6 = vadd.f32 %v528_v1, %v527_v61 }
 0x398   :  { %v525_v0 = vmul.f32 %v517_v47, %v505_v60  ;;  %v532_v9 = vsel %vm175_vm1, %v526_v63, 0.0 }
 0x39a   :  { %v530_v7 = vsel %vm175_vm1, %v525_v0, 0.0 }
 0x39b   :  { %v531_v8 = vadd.f32 %v530_v7, %v529_v6 }
 0x39d   :  { %v533_v10 = vadd.f32 %v532_v9, %v531_v8 }
 0x39f   :  { %v534_v11 = vrot.slane %v533_v10, 4 }
 0x3a1   :  { %v535_v12 = vadd.f32 %v534_v11, %v533_v10 }
 0x3a3   :  { %v536_v3 = vrot.slane %v535_v12, 2 }
 0x3a5   :  { %v537_v13 = vadd.f32 %v536_v3, %v535_v12 }
 0x3a7   :  { %v538_v14 = vrot.slane %v537_v13, 1 }
 0x3a9   :  { %v539_v2 = vadd.f32 %v538_v14, %v537_v13 }
 0x3ab   :  { %v544_v5 = vadd.f32 %v542_v15, %v539_v2 }
 0x3ad   :  { %546 = vst.msk [vmem:[#allocation8] sm:$0x1] %vm545_vm3, %v544_v5 }
 0x3ae   :  { %740 = shalt.err (!%p737_p5)
}
 0x3af   :  { %556 = dma.vmem_to_hbm [thread:$0]  %s554_s29, 16, %s887_s3, [#allocation4]  }
 0x3b0   :  { %753 = dma.done.wait [#allocation4], 16  }
 0x3b1   :  { %754 = vsyncadd [#allocation4], 4294967280 }
 0x3b2   :  { %560 = vsyncpa [#allocation3], 1 }
 0x3b3   :  { %561 = vsyncpa [#allocation6], 1 }
 0x3b4   :  { %562 = vsyncpa [#allocation4], 1 }

</bundles_post_ra>
